<compile_context>
chip_gen: v7x
topology: tpu7x:2x2x1
jax: 0.10.0
libtpu: 0.0.40
codegen_flags: <defaults>
</compile_context>

<pallas_src>
import jax
import jax.numpy as jnp
from jax import lax
from jax.experimental import pallas as pl
from jax.experimental.pallas import tpu as pltpu

SMOOTH = 1.0
_LANES = 128


# --------------------------------------------------------------------------
# Hardware-aware tuning helpers
# --------------------------------------------------------------------------
def _tpu_tuning():
    """Returns (num_tensorcores, vmem_limit_bytes, per_step_streamed_bytes)."""
    cap = 128 * 1024 * 1024
    try:
        cap = int(pltpu.get_tpu_info().vmem_capacity_bytes)
    except Exception:
        pass
    kind = ""
    try:
        kind = jax.devices()[0].device_kind.lower()
    except Exception:
        pass
    if "v7" in kind:                       # 2 TCs, 3.2 TB/s, 64 MiB VMEM
        ncores, target = 2, 10 << 20
    elif "v6" in kind or "trillium" in kind:
        ncores, target = 1, 5 << 20
    elif "v5" in kind:
        ncores, target = 1, 7 << 19        # ~3.5 MiB
    else:
        ncores, target = 1, 6 << 20
        try:
            info = pltpu.get_tpu_info()
            for attr in ("num_cores", "core_count", "tensorcore_count",
                         "num_tensorcores"):
                v = getattr(info, attr, None)
                if v:
                    ncores = max(1, int(v))
                    break
        except Exception:
            pass
    # ~75% of physical VMEM (48 MiB on v7x, 96 MiB on v5e/v6e).
    vmem_limit = min((cap * 3) // 4, 96 << 20)
    return ncores, vmem_limit, target


def _pick_block_rows(n, r, sz_sum, vmem_limit, ncores, target_bytes, granule,
                     override=None):
    """Rows-of-128 per block: VMEM-budgeted and sized to amortize per-step cost."""
    headroom = 2 * 1024 * 1024
    budget = max(vmem_limit - headroom, 1 << 20)
    # Double-buffered logits+targets dominate VMEM; accumulators are tiny now.
    per_row = 2 * n * _LANES * sz_sum
    tk_budget = max(1, budget // per_row)
    if override is not None:
        tk = max(1, int(override))
    else:
        tk_target = max(1, target_bytes // (n * _LANES * sz_sum))
        cap_rows = max(1, -(-r // ncores))      # >= 1 block per core chunk
        tk = min(tk_target, cap_rows)
    tk = min(tk, tk_budget)
    if tk >= r:
        return r                                # full-extent block
    tk = max(granule, (tk // granule) * granule)
    return min(tk, r)


# --------------------------------------------------------------------------
# Kernel
# --------------------------------------------------------------------------
def _make_kernel(n, tk, d, k_grid, granule, chunked, needs_mask):
    g = tk // granule if chunked else 0

    def kernel(logits_ref, targets_ref, inter_ref, psum_ref, tsum_ref,
               acc_i, acc_p, acc_t):
        k = pl.program_id(1)

        @pl.when(k == 0)
        def _():
            acc_i[...] = jnp.zeros_like(acc_i)
            acc_p[...] = jnp.zeros_like(acc_p)
            acc_t[...] = jnp.zeros_like(acc_t)

        # Absolute first row-of-128 of this block (for tail masking).
        block_row0 = (pl.program_id(0) * k_grid + k) * tk

        def make_rl(rows):
            return (lax.broadcasted_iota(jnp.int32, (rows, _LANES), 0) * _LANES
                    + lax.broadcasted_iota(jnp.int32, (rows, _LANES), 1))

        def apply_mask(p, t, rl, row_off):
            flat0 = (block_row0 + row_off) * _LANES
            m = (rl + flat0) < d
            return jnp.where(m[None], p, 0.0), jnp.where(m[None], t, 0.0)

        if chunked:
            # Stream the block in granule-row chunks; partial sums stay in
            # vregs (fori_loop carries) -> no per-vreg accumulator RMW.
            rl = make_rl(granule) if needs_mask else None

            def body(j, carry):
                ci, cp, ct = carry
                row = pl.multiple_of(j * granule, granule)
                p = jax.nn.sigmoid(
                    logits_ref[:, pl.ds(row, granule), :].astype(jnp.float32))
                t = targets_ref[:, pl.ds(row, granule), :].astype(jnp.float32)
                if needs_mask:
                    p, t = apply_mask(p, t, rl, row)
                return ci + p * t, cp + p, ct + t

            zeros = jnp.zeros((n, granule, _LANES), jnp.float32)
            si, sp, st = lax.fori_loop(0, g, body, (zeros, zeros, zeros),
                                       unroll=min(4, g))
            acc_i[...] += si
            acc_p[...] += sp
            acc_t[...] += st
        else:
            # Small full-extent block (tk not a granule multiple): simple path.
            p = jax.nn.sigmoid(logits_ref[...].astype(jnp.float32))
            t = targets_ref[...].astype(jnp.float32)
            if needs_mask:
                p, t = apply_mask(p, t, make_rl(tk), 0)
            acc_i[...] += p * t
            acc_p[...] += p
            acc_t[...] += t

        # Finalize: fold the sublane axis once; keep 128 lanes dense in the
        # output (reduced later in the tiny JAX wrapper).
        @pl.when(k == pl.num_programs(1) - 1)
        def _():
            inter_ref[...] = jnp.sum(acc_i[...], axis=1)[None]
            psum_ref[...] = jnp.sum(acc_p[...], axis=1)[None]
            tsum_ref[...] = jnp.sum(acc_t[...], axis=1)[None]

    return kernel


# --------------------------------------------------------------------------
# Wrapper
# --------------------------------------------------------------------------
def soft_dice_loss(logits, targets, smooth=SMOOTH, block_rows=None):
    """SoftDiceLoss forward.  logits/targets may be f32, bf16, int8 or bool;
    narrower dtypes halve/quarter HBM traffic (accumulation is always f32)."""
    if logits.shape != targets.shape:
        raise ValueError("logits and targets must have the same shape")

    n = logits.shape[0]
    d = 1
    for s in logits.shape[1:]:
        d *= s

    r = pl.cdiv(d, _LANES)          # rows of 128 lanes per sample
    d128 = r * _LANES

    ncores, vmem_limit, target_bytes = _tpu_tuning()
    sz_l = logits.dtype.itemsize
    sz_t = targets.dtype.itemsize
    # Chunk granule aligned to the packed-sublane tile of the narrowest dtype.
    granule = min(32, 8 * max(1, 4 // max(1, min(sz_l, sz_t))))

    tk = _pick_block_rows(n, r, sz_l + sz_t, vmem_limit, ncores, target_bytes,
                          granule, block_rows)

    nb = pl.cdiv(r, tk)                              # number of row-blocks
    p_grid = ncores if (ncores > 1 and nb >= 2) else 1
    k_grid = pl.cdiv(nb, p_grid)
    needs_mask = (p_grid * k_grid * tk * _LANES != d)
    chunked = (tk % granule == 0)
    acc_rows = granule if chunked else tk

    # Flatten (free).  Only pad to the next 128-lane multiple when needed;
    # fill value is irrelevant because the kernel masks the tail itself.
    def prep(x):
        x2 = x.reshape(n, d)
        if d128 != d:
            x2 = jnp.pad(x2, ((0, 0), (0, d128 - d)))
        return x2.reshape(n, r, _LANES)

    m1 = prep(logits)
    m2 = prep(targets)

    if p_grid * k_grid == nb:
        def in_idx(pi, ki):
            return (0, pi * k_grid + ki, 0)
    else:
        last_b = nb - 1

        def in_idx(pi, ki):
            # Clamp phantom blocks of the parallel split; they are masked
            # to zero in-kernel.
            return (0, jnp.minimum(pi * k_grid + ki, last_b), 0)

    in_spec = pl.BlockSpec((n, tk, _LANES), in_idx)
    out_spec = pl.BlockSpec((1, n, _LANES), lambda pi, ki: (pi, 0, 0))
    part_shape = jax.ShapeDtypeStruct((p_grid, n, _LANES), jnp.float32)

    kernel = _make_kernel(n=n, tk=tk, d=d, k_grid=k_grid, granule=granule,
                          chunked=chunked, needs_mask=needs_mask)

    inter, psum, tsum = pl.pallas_call(
        kernel,
        out_shape=(part_shape, part_shape, part_shape),
        grid_spec=pltpu.PrefetchScalarGridSpec(
            num_scalar_prefetch=0,
            grid=(p_grid, k_grid),
            in_specs=[in_spec, in_spec],
            out_specs=(out_spec, out_spec, out_spec),
            scratch_shapes=[
                pltpu.VMEM((n, acc_rows, _LANES), jnp.float32),  # probs*targets
                pltpu.VMEM((n, acc_rows, _LANES), jnp.float32),  # probs
                pltpu.VMEM((n, acc_rows, _LANES), jnp.float32),  # targets
            ],
        ),
        compiler_params=pltpu.CompilerParams(
            dimension_semantics=("parallel", "arbitrary"),
            vmem_limit_bytes=int(vmem_limit),
        ),
    )(m1, m2)

    # Tiny epilogue in plain JAX: fold parallel chunks + lanes, dice score.
    inter = jnp.sum(inter, axis=(0, 2))
    psum = jnp.sum(psum, axis=(0, 2))
    tsum = jnp.sum(tsum, axis=(0, 2))
    score = 2.0 * (inter + smooth) / (psum + tsum + smooth)
    return 1.0 - jnp.sum(score) / n


def soft_dice_loss_ref(logits, targets, smooth=SMOOTH):
    n = logits.shape[0]
    probs = jax.nn.sigmoid(logits.astype(jnp.float32))
    m1 = probs.reshape(n, -1)
    m2 = targets.astype(jnp.float32).reshape(n, -1)
    inter = jnp.sum(m1 * m2, axis=1)
    score = 2.0 * (inter + smooth) / (jnp.sum(m1, axis=1) + jnp.sum(m2, axis=1) + smooth)
    return 1.0 - jnp.sum(score) / n


if __name__ == "__main__":
    key = jax.random.PRNGKey(0)
    k1, k2, k3, k4, k5, k6, k7, k8 = jax.random.split(key, 8)

    # 1) Small NCHW case, D divisible by 128 -> fully copy-free reshape path.
    N, C, H, W = 2, 4, 16, 16
    logits = jax.random.normal(k1, (N, C, H, W), dtype=jnp.float32)
    targets = (jax.random.uniform(k2, (N, C, H, W)) > 0.5).astype(jnp.float32)
    loss = soft_dice_loss(logits, targets)
    jax.block_until_ready(loss)
    ref = soft_dice_loss_ref(logits, targets)
    assert jnp.allclose(loss, ref, atol=1e-5, rtol=1e-5), (loss, ref)

    # 2) D not a multiple of 128 -> in-kernel tail masking, multi-block
    #    reduction, parallel split on 2-TC chips.
    logits2 = jax.random.normal(k3, (2, 4, 100, 100), dtype=jnp.float32)
    targets2 = (jax.random.uniform(k4, (2, 4, 100, 100)) > 0.5).astype(jnp.float32)
    loss2 = soft_dice_loss(logits2, targets2, block_rows=32)
    jax.block_until_ready(loss2)
    ref2 = soft_dice_loss_ref(logits2, targets2)
    assert jnp.allclose(loss2, ref2, atol=1e-4, rtol=1e-5), (loss2, ref2)

    # 3) bf16 inputs (halved HBM traffic), ragged tail + mask.
    logits3 = jax.random.normal(k5, (2, 3, 40, 30), dtype=jnp.bfloat16)
    targets3 = (jax.random.uniform(k6, (2, 3, 40, 30)) > 0.5).astype(jnp.bfloat16)
    loss3 = soft_dice_loss(logits3, targets3, block_rows=16)
    jax.block_until_ready(loss3)
    ref3 = soft_dice_loss_ref(logits3, targets3)
    assert jnp.allclose(loss3, ref3, atol=1e-4, rtol=1e-4), (loss3, ref3)

    # 4) Tiny input (D < 1024, rows not 8-aligned) -> single full-extent block.
    logits4 = jax.random.normal(k7, (3, 5, 7, 11), dtype=jnp.float32)
    targets4 = (jax.random.uniform(k8, (3, 5, 7, 11)) > 0.5).astype(jnp.float32)
    loss4 = soft_dice_loss(logits4, targets4)
    jax.block_until_ready(loss4)
    ref4 = soft_dice_loss_ref(logits4, targets4)
    assert jnp.allclose(loss4, ref4, atol=1e-5, rtol=1e-5), (loss4, ref4)

    print("KERNEL_OK")
</pallas_src>

<mosaic_0001>
module attributes {stable_mosaic.version = 11 : i64} {
  func.func @kernel(%arg0: i32, %arg1: i32, %arg2: memref<2x8x128xf32, #tpu.memory_space<vmem>>, %arg3: memref<2x8x128xf32, #tpu.memory_space<vmem>>, %arg4: memref<1x2x128xf32, #tpu.memory_space<vmem>>, %arg5: memref<1x2x128xf32, #tpu.memory_space<vmem>>, %arg6: memref<1x2x128xf32, #tpu.memory_space<vmem>>, %arg7: memref<2x8x128xf32, #tpu.memory_space<vmem>>, %arg8: memref<2x8x128xf32, #tpu.memory_space<vmem>>, %arg9: memref<2x8x128xf32, #tpu.memory_space<vmem>>) attributes {dimension_semantics = [#tpu.dimension_semantics<parallel>, #tpu.dimension_semantics<arbitrary>], iteration_bounds = array<i64: 1, 1>, scalar_prefetch = 0 : i64, scratch_operands = 3 : i64, tpu.core_type = #tpu.core_type<tc>, window_params = [{transform_indices = @transform_0, window_bounds = array<i64: 2, 8, 128>}, {transform_indices = @transform_1, window_bounds = array<i64: 2, 8, 128>}, {transform_indices = @transform_2, window_bounds = array<i64: 1, 2, 128>}, {transform_indices = @transform_3, window_bounds = array<i64: 1, 2, 128>}, {transform_indices = @transform_4, window_bounds = array<i64: 1, 2, 128>}]} {
    %c0_i32 = arith.constant 0 : i32
    %0 = arith.cmpi eq, %arg1, %c0_i32 : i32
    %1 = arith.extui %0 : i1 to i32
    %c0_i32_0 = arith.constant 0 : i32
    %2 = arith.cmpi ne, %1, %c0_i32_0 : i32
    scf.if %2 {
      %cst_26 = arith.constant 0.000000e+00 : f32
      %31 = vector.broadcast %cst_26 : f32 to vector<2x8x128xf32>
      %c0_27 = arith.constant 0 : index
      %c0_28 = arith.constant 0 : index
      %c0_29 = arith.constant 0 : index
      %32 = vector.load %arg7[%c0_27, %c0_28, %c0_29] : memref<2x8x128xf32, #tpu.memory_space<vmem>>, vector<2x8x128xf32>
      tpu.vector_store %arg7[%c0_27, %c0_28, %c0_29], %31 {strides = array<i32>} : memref<2x8x128xf32, #tpu.memory_space<vmem>>, vector<2x8x128xf32>,
      %cst_30 = arith.constant 0.000000e+00 : f32
      %33 = vector.broadcast %cst_30 : f32 to vector<2x8x128xf32>
      %c0_31 = arith.constant 0 : index
      %c0_32 = arith.constant 0 : index
      %c0_33 = arith.constant 0 : index
      %34 = vector.load %arg8[%c0_31, %c0_32, %c0_33] : memref<2x8x128xf32, #tpu.memory_space<vmem>>, vector<2x8x128xf32>
      tpu.vector_store %arg8[%c0_31, %c0_32, %c0_33], %33 {strides = array<i32>} : memref<2x8x128xf32, #tpu.memory_space<vmem>>, vector<2x8x128xf32>,
      %cst_34 = arith.constant 0.000000e+00 : f32
      %35 = vector.broadcast %cst_34 : f32 to vector<2x8x128xf32>
      %c0_35 = arith.constant 0 : index
      %c0_36 = arith.constant 0 : index
      %c0_37 = arith.constant 0 : index
      %36 = vector.load %arg9[%c0_35, %c0_36, %c0_37] : memref<2x8x128xf32, #tpu.memory_space<vmem>>, vector<2x8x128xf32>
      tpu.vector_store %arg9[%c0_35, %c0_36, %c0_37], %35 {strides = array<i32>} : memref<2x8x128xf32, #tpu.memory_space<vmem>>, vector<2x8x128xf32>,
    } else {
    }
    %cst = arith.constant 0.000000e+00 : f32
    %3 = vector.broadcast %cst : f32 to vector<2x8x128xf32>
    %c0_i32_1 = arith.constant 0 : i32
    %c8_i32 = arith.constant 8 : i32
    %4 = arith.muli %c0_i32_1, %c8_i32 : i32
    %5 = tpu.assume_multiple %4, 8 : i32
    %c0 = arith.constant 0 : index
    %6 = arith.index_cast %5 : i32 to index
    %c0_2 = arith.constant 0 : index
    %7 = vector.load %arg2[%c0, %6, %c0_2] : memref<2x8x128xf32, #tpu.memory_space<vmem>>, vector<2x8x128xf32>
    %8 = arith.negf %7 : vector<2x8x128xf32>
    %9 = math.exp %8 : vector<2x8x128xf32>
    %cst_3 = arith.constant 1.000000e+00 : f32
    %10 = vector.broadcast %cst_3 : f32 to vector<2x8x128xf32>
    %11 = arith.addf %10, %9 : vector<2x8x128xf32>
    %12 = arith.divf %10, %11 : vector<2x8x128xf32>
    %c0_4 = arith.constant 0 : index
    %13 = arith.index_cast %5 : i32 to index
    %c0_5 = arith.constant 0 : index
    %14 = vector.load %arg3[%c0_4, %13, %c0_5] : memref<2x8x128xf32, #tpu.memory_space<vmem>>, vector<2x8x128xf32>
    %15 = arith.mulf %12, %14 : vector<2x8x128xf32>
    %16 = arith.addf %3, %15 : vector<2x8x128xf32>
    %17 = arith.addf %3, %12 : vector<2x8x128xf32>
    %18 = arith.addf %3, %14 : vector<2x8x128xf32>
    %c1_i32 = arith.constant 1 : i32
    %c0_6 = arith.constant 0 : index
    %c0_7 = arith.constant 0 : index
    %c0_8 = arith.constant 0 : index
    %19 = vector.load %arg7[%c0_6, %c0_7, %c0_8] : memref<2x8x128xf32, #tpu.memory_space<vmem>>, vector<2x8x128xf32>
    %20 = arith.addf %19, %16 : vector<2x8x128xf32>
    %c0_9 = arith.constant 0 : index
    %c0_10 = arith.constant 0 : index
    %c0_11 = arith.constant 0 : index
    %21 = vector.load %arg7[%c0_9, %c0_10, %c0_11] : memref<2x8x128xf32, #tpu.memory_space<vmem>>, vector<2x8x128xf32>
    tpu.vector_store %arg7[%c0_9, %c0_10, %c0_11], %20 {strides = array<i32>} : memref<2x8x128xf32, #tpu.memory_space<vmem>>, vector<2x8x128xf32>,
    %c0_12 = arith.constant 0 : index
    %c0_13 = arith.constant 0 : index
    %c0_14 = arith.constant 0 : index
    %22 = vector.load %arg8[%c0_12, %c0_13, %c0_14] : memref<2x8x128xf32, #tpu.memory_space<vmem>>, vector<2x8x128xf32>
    %23 = arith.addf %22, %17 : vector<2x8x128xf32>
    %c0_15 = arith.constant 0 : index
    %c0_16 = arith.constant 0 : index
    %c0_17 = arith.constant 0 : index
    %24 = vector.load %arg8[%c0_15, %c0_16, %c0_17] : memref<2x8x128xf32, #tpu.memory_space<vmem>>, vector<2x8x128xf32>
    tpu.vector_store %arg8[%c0_15, %c0_16, %c0_17], %23 {strides = array<i32>} : memref<2x8x128xf32, #tpu.memory_space<vmem>>, vector<2x8x128xf32>,
    %c0_18 = arith.constant 0 : index
    %c0_19 = arith.constant 0 : index
    %c0_20 = arith.constant 0 : index
    %25 = vector.load %arg9[%c0_18, %c0_19, %c0_20] : memref<2x8x128xf32, #tpu.memory_space<vmem>>, vector<2x8x128xf32>
    %26 = arith.addf %25, %18 : vector<2x8x128xf32>
    %c0_21 = arith.constant 0 : index
    %c0_22 = arith.constant 0 : index
    %c0_23 = arith.constant 0 : index
    %27 = vector.load %arg9[%c0_21, %c0_22, %c0_23] : memref<2x8x128xf32, #tpu.memory_space<vmem>>, vector<2x8x128xf32>
    tpu.vector_store %arg9[%c0_21, %c0_22, %c0_23], %26 {strides = array<i32>} : memref<2x8x128xf32, #tpu.memory_space<vmem>>, vector<2x8x128xf32>,
    %c0_i32_24 = arith.constant 0 : i32
    %28 = arith.cmpi eq, %arg1, %c0_i32_24 : i32
    %29 = arith.extui %28 : i1 to i32
    %c0_i32_25 = arith.constant 0 : i32
    %30 = arith.cmpi ne, %29, %c0_i32_25 : i32
    scf.if %30 {
      %c0_26 = arith.constant 0 : index
      %c0_27 = arith.constant 0 : index
      %c0_28 = arith.constant 0 : index
      %31 = vector.load %arg7[%c0_26, %c0_27, %c0_28] : memref<2x8x128xf32, #tpu.memory_space<vmem>>, vector<2x8x128xf32>
      %cst_29 = arith.constant dense<0.000000e+00> : vector<2x128xf32>
      %32 = vector.multi_reduction <add>, %31, %cst_29 [1] : vector<2x8x128xf32> to vector<2x128xf32>
      %33 = vector.shape_cast %32 : vector<2x128xf32> to vector<1x2x128xf32>
      %c0_30 = arith.constant 0 : index
      %c0_31 = arith.constant 0 : index
      %c0_32 = arith.constant 0 : index
      %34 = vector.load %arg4[%c0_30, %c0_31, %c0_32] : memref<1x2x128xf32, #tpu.memory_space<vmem>>, vector<1x2x128xf32>
      tpu.vector_store %arg4[%c0_30, %c0_31, %c0_32], %33 {strides = array<i32>} : memref<1x2x128xf32, #tpu.memory_space<vmem>>, vector<1x2x128xf32>,
      %c0_33 = arith.constant 0 : index
      %c0_34 = arith.constant 0 : index
      %c0_35 = arith.constant 0 : index
      %35 = vector.load %arg8[%c0_33, %c0_34, %c0_35] : memref<2x8x128xf32, #tpu.memory_space<vmem>>, vector<2x8x128xf32>
      %cst_36 = arith.constant dense<0.000000e+00> : vector<2x128xf32>
      %36 = vector.multi_reduction <add>, %35, %cst_36 [1] : vector<2x8x128xf32> to vector<2x128xf32>
      %37 = vector.shape_cast %36 : vector<2x128xf32> to vector<1x2x128xf32>
      %c0_37 = arith.constant 0 : index
      %c0_38 = arith.constant 0 : index
      %c0_39 = arith.constant 0 : index
      %38 = vector.load %arg5[%c0_37, %c0_38, %c0_39] : memref<1x2x128xf32, #tpu.memory_space<vmem>>, vector<1x2x128xf32>
      tpu.vector_store %arg5[%c0_37, %c0_38, %c0_39], %37 {strides = array<i32>} : memref<1x2x128xf32, #tpu.memory_space<vmem>>, vector<1x2x128xf32>,
      %c0_40 = arith.constant 0 : index
      %c0_41 = arith.constant 0 : index
      %c0_42 = arith.constant 0 : index
      %39 = vector.load %arg9[%c0_40, %c0_41, %c0_42] : memref<2x8x128xf32, #tpu.memory_space<vmem>>, vector<2x8x128xf32>
      %cst_43 = arith.constant dense<0.000000e+00> : vector<2x128xf32>
      %40 = vector.multi_reduction <add>, %39, %cst_43 [1] : vector<2x8x128xf32> to vector<2x128xf32>
      %41 = vector.shape_cast %40 : vector<2x128xf32> to vector<1x2x128xf32>
      %c0_44 = arith.constant 0 : index
      %c0_45 = arith.constant 0 : index
      %c0_46 = arith.constant 0 : index
      %42 = vector.load %arg6[%c0_44, %c0_45, %c0_46] : memref<1x2x128xf32, #tpu.memory_space<vmem>>, vector<1x2x128xf32>
      tpu.vector_store %arg6[%c0_44, %c0_45, %c0_46], %41 {strides = array<i32>} : memref<1x2x128xf32, #tpu.memory_space<vmem>>, vector<1x2x128xf32>,
    } else {
    }
    return
  }
  func.func @transform_0(%arg0: i32, %arg1: i32) -> (i32, i32, i32) {
    %c1_i32 = arith.constant 1 : i32
    %0 = arith.muli %arg0, %c1_i32 : i32
    %1 = arith.addi %0, %arg1 : i32
    %c0_i32 = arith.constant 0 : i32
    %c0_i32_0 = arith.constant 0 : i32
    %c0_i32_1 = arith.constant 0 : i32
    return %c0_i32, %1, %c0_i32_0 : i32, i32, i32
  }
  func.func @transform_1(%arg0: i32, %arg1: i32) -> (i32, i32, i32) {
    %c1_i32 = arith.constant 1 : i32
    %0 = arith.muli %arg0, %c1_i32 : i32
    %1 = arith.addi %0, %arg1 : i32
    %c0_i32 = arith.constant 0 : i32
    %c0_i32_0 = arith.constant 0 : i32
    %c0_i32_1 = arith.constant 0 : i32
    return %c0_i32, %1, %c0_i32_0 : i32, i32, i32
  }
  func.func @transform_2(%arg0: i32, %arg1: i32) -> (i32, i32, i32) {
    %c0_i32 = arith.constant 0 : i32
    %c0_i32_0 = arith.constant 0 : i32
    %c0_i32_1 = arith.constant 0 : i32
    return %arg0, %c0_i32, %c0_i32_0 : i32, i32, i32
  }
  func.func @transform_3(%arg0: i32, %arg1: i32) -> (i32, i32, i32) {
    %c0_i32 = arith.constant 0 : i32
    %c0_i32_0 = arith.constant 0 : i32
    %c0_i32_1 = arith.constant 0 : i32
    return %arg0, %c0_i32, %c0_i32_0 : i32, i32, i32
  }
  func.func @transform_4(%arg0: i32, %arg1: i32) -> (i32, i32, i32) {
    %c0_i32 = arith.constant 0 : i32
    %c0_i32_0 = arith.constant 0 : i32
    %c0_i32_1 = arith.constant 0 : i32
    return %arg0, %c0_i32, %c0_i32_0 : i32, i32, i32
  }
}

</mosaic_0001>

<bundles_post_ra>
// kernel: tpu_custom_call.1
= control target key start
LH: loop header
LB: loop body
LE: loop exit
PB: predicated region body
PF: predicated region fallthrough
CT: control target
= control target key end

     0   :  { %10 = vsyncpa [#allocation6], 0  ;;  %s452_s0 = inlined_call_operand.hbm [shape: f32[2,8,128], index: 0, kind: input, shape index: {}]   ;;  %s453_s1 = inlined_call_operand.hbm [shape: f32[2,8,128], index: 1, kind: input, shape index: {}]   ;;  %s454_s2 = inlined_call_operand.hbm [shape: f32[1,2,128], index: 2, kind: output, shape index: {0}]   ;;  %s455_s3 = inlined_call_operand.hbm [shape: f32[1,2,128], index: 3, kind: output, shape index: {1}]   ;;  %s456_s4 = inlined_call_operand.hbm [shape: f32[1,2,128], index: 4, kind: output, shape index: {2}]  }
   0x1   :  { %11 = vsyncpa [#allocation9], 0 }
   0x2   :  { %12 = vsyncpa [#allocation7], 0 }
   0x3   :  { %13 = vsyncpa [#allocation12], 0  ;;  %s343_s15 = smov [#allocation5]   ;;  %s225_s19 = scalar_lea.hbm %s452_s0, 256 }
   0x4   :  { %s22_s16 = sshll.u32 %s343_s15, 4  ;;  %p226_p0 = scmp.ne.s32.totalorder %s452_s0, %s225_s19  ;;  %s23_s16 = int_to_ptr.vmem [resolvable:$true] %s22_s16 }
   0x5   :  { %p229_p1 = scmp.lt.u32.totalorder %s225_s19, %s452_s0 }
   0x7   :  { %p231_p2 = pnand %p229_p1, %p226_p0 }
   0x9   :  { %234 = shalt.err (!%p231_p2)
}
   0xa   :  { %s235_s24 = scalar_lea.vmem %s23_s16, 256  ;;  %p240_p4 = scmp.lt.s32.totalorder %s23_s16, %s23_s16 }
   0xb   :  { %p236_p3 = scmp.ne.s32.totalorder %s23_s16, %s235_s24  ;;  %p241_p5 = scmp.lt.s32.totalorder %s235_s24, %s235_s24 }
   0xd   :  { %p242_p6 = por %p241_p5, %p240_p4 }
   0xf   :  { %p243_p7 = pnand %p242_p6, %p236_p3 }
  0x11   :  { %246 = shalt.err (!%p243_p7)
}
  0x12   :  { %s344_s25 = smov 128   ;;  %s345_s26 = smov 8  }
  0x13   :  { %28 = dma.hbm_to_vmem [thread:$0]  %s452_s0, 256, %s23_s16, [#allocation6], %s344_s25, %s344_s25, %s345_s26  }
  0x14   :  { %s346_s29 = smov [#allocation8]   ;;  %s247_s7 = scalar_lea.hbm %s453_s1, 256 }
  0x15   :  { %s37_s30 = sshll.u32 %s346_s29, 4  ;;  %p248_p8 = scmp.ne.s32.totalorder %s453_s1, %s247_s7  ;;  %s38_s30 = int_to_ptr.vmem [resolvable:$true] %s37_s30 }
  0x16   :  { %p251_p9 = scmp.lt.u32.totalorder %s247_s7, %s453_s1 }
  0x18   :  { %p253_p10 = pnand %p251_p9, %p248_p8 }
  0x1a   :  { %256 = shalt.err (!%p253_p10)
}
  0x1b   :  { %s257_s12 = scalar_lea.vmem %s38_s30, 256  ;;  %p262_p12 = scmp.lt.s32.totalorder %s38_s30, %s38_s30 }
  0x1c   :  { %p258_p11 = scmp.ne.s32.totalorder %s38_s30, %s257_s12  ;;  %p263_p13 = scmp.lt.s32.totalorder %s257_s12, %s257_s12 }
  0x1e   :  { %p264_p0 = por %p263_p13, %p262_p12 }
  0x20   :  { %p265_p1 = pnand %p264_p0, %p258_p11 }
  0x22   :  { %268 = shalt.err (!%p265_p1)
}
  0x23   :  { %43 = dma.hbm_to_vmem [thread:$0]  %s453_s1, 256, %s38_s30, [#allocation9], %s344_s25, %s344_s25, %s345_s26  }
  0x24   :  { %335 = dma.done.wait [#allocation6], 256  }
  0x25   :  { %336 = vsyncadd [#allocation6], 4294967040 }
  0x26   :  { %337 = dma.done.wait [#allocation9], 256  }
  0x27   :  { %338 = vsyncadd [#allocation9], 4294967040  ;;  %v62_v0 = vld [vmem:[#allocation5] sm:$0xff]  ;;  %v63_v1 = vld [vmem:[#allocation5 + $0x8] sm:$0xff]  ;;  %vm123_vm0 = vcmask 1041409   ;;  %s347_s1 = smov [#allocation11]  }
  0x28   :  { %v76_v2 = vld [vmem:[#allocation8] sm:$0xff]  ;;  %v208_v3 = vmul.f32 -1.442695, %v62_v0  ;;  %v209_v4 = vmul.f32 -1.442695, %v63_v1  ;;  %v77_v5 = vld [vmem:[#allocation8 + $0x8] sm:$0xff] }
  0x29   :  { %v148_v6 = vrot.slane %v76_v2, 4  ;;  %v154_v7 = vrot.slane %v77_v5, 4  ;;  %s181_s14 = sshll.u32 %s347_s1, 4  ;;  %s348_s15 = smov [#allocation13]   ;;  %s182_s14 = int_to_ptr.vmem [resolvable:$true] %s181_s14 }
  0x2a   :  { %217 = vpow2.f32 %v208_v3  ;;  %s191_s16 = sshll.u32 %s348_s15, 4  ;;  %s349_s17 = smov [#allocation10]   ;;  %s401_s16 = int_to_ptr.vmem [resolvable:$true] %s191_s16 }
  0x2b   :  { %v149_v8 = vadd.f32 %v148_v6, %v76_v2  ;;  %219 = vpow2.f32 %v209_v4  ;;  %v155_v9 = vadd.f32 %v154_v7, %v77_v5  ;;  %s171_s18 = sshll.u32 %s349_s17, 4  ;;  %s269_s19 = scalar_lea.vmem %s182_s14, 32  ;;  %s403_s18 = int_to_ptr.vmem [resolvable:$true] %s171_s18 }
  0x2c   :  { %p270_p2 = scmp.ne.s32.totalorder %s182_s14, %s269_s19  ;;  %p274_p3 = scmp.lt.s32.totalorder %s182_s14, %s182_s14 }
  0x2d   :  { %v150_v10 = vrot.slane %v149_v8, 2  ;;  %v156_v11 = vrot.slane %v155_v9, 2  ;;  %p275_p4 = scmp.lt.s32.totalorder %s269_s19, %s269_s19 }
  0x2f   :  { %v151_v12 = vadd.f32 %v150_v10, %v149_v8  ;;  %v157_v13 = vadd.f32 %v156_v11, %v155_v9  ;;  %p276_p5 = por %p275_p4, %p274_p3 }
  0x31   :  { %v152_v14 = vrot.slane %v151_v12, 1  ;;  %v158_v15 = vrot.slane %v157_v13, 1  ;;  %p277_p6 = pnand %p276_p5, %p270_p2 }
  0x33   :  { %v153_v16 = vadd.f32 %v152_v14, %v151_v12  ;;  %v159_v17 = vadd.f32 %v158_v15, %v157_v13 }
  0x34   :  { %v218_v18 = vpop.eup %217 }
  0x35   :  { %v220_v19 = vpop.eup %219  ;;  %v70_v20 = vadd.f32 1.0, %v218_v18  ;;  %v162_v21 = vsel %vm123_vm0, %v159_v17, %v153_v16 }
  0x36   :  { %v71_v22 = vadd.f32 1.0, %v220_v19  ;;  %164 = vst [vmem:[#allocation13] sm:$0x3] %v162_v21 }
  0x37   :  { %221 = vrcp.f32 %v70_v20 }
  0x38   :  { %223 = vrcp.f32 %v71_v22 }
  0x41   :  { %v222_v23 = vpop.eup %221 }
  0x42   :  { %v224_v24 = vpop.eup %223  ;;  %v129_v25 = vrot.slane %v222_v23, 4  ;;  %v78_v26 = vmul.f32 %v222_v23, %v76_v2 }
  0x43   :  { %v135_v27 = vrot.slane %v224_v24, 4  ;;  %v79_v28 = vmul.f32 %v224_v24, %v77_v5 }
  0x44   :  { %v130_v29 = vadd.f32 %v222_v23, %v129_v25  ;;  %v109_v30 = vrot.slane %v78_v26, 4 }
  0x45   :  { %v136_v31 = vadd.f32 %v224_v24, %v135_v27  ;;  %v115_v32 = vrot.slane %v79_v28, 4 }
  0x46   :  { %v131_v33 = vrot.slane %v130_v29, 2  ;;  %v110_v34 = vadd.f32 %v109_v30, %v78_v26 }
  0x47   :  { %v137_v35 = vrot.slane %v136_v31, 2  ;;  %v116_v36 = vadd.f32 %v115_v32, %v79_v28 }
  0x48   :  { %v132_v37 = vadd.f32 %v131_v33, %v130_v29  ;;  %v111_v38 = vrot.slane %v110_v34, 2 }
  0x49   :  { %v138_v39 = vadd.f32 %v137_v35, %v136_v31  ;;  %v117_v40 = vrot.slane %v116_v36, 2 }
  0x4a   :  { %v133_v41 = vrot.slane %v132_v37, 1  ;;  %v112_v42 = vadd.f32 %v111_v38, %v110_v34 }
  0x4b   :  { %v139_v43 = vrot.slane %v138_v39, 1  ;;  %v118_v44 = vadd.f32 %v117_v40, %v116_v36 }
  0x4c   :  { %v134_v45 = vadd.f32 %v133_v41, %v132_v37  ;;  %v113_v46 = vrot.slane %v112_v42, 1 }
  0x4d   :  { %v140_v47 = vadd.f32 %v139_v43, %v138_v39  ;;  %v119_v48 = vrot.slane %v118_v44, 1 }
  0x4e   :  { %v114_v49 = vadd.f32 %v113_v46, %v112_v42 }
  0x4f   :  { %v143_v50 = vsel %vm123_vm0, %v140_v47, %v134_v45  ;;  %v120_v51 = vadd.f32 %v119_v48, %v118_v44 }
  0x50   :  { %145 = vst [vmem:[#allocation11] sm:$0x3] %v143_v50 }
  0x51   :  { %v124_v52 = vsel %vm123_vm0, %v120_v51, %v114_v49 }
  0x52   :  { %280 = shalt.err (!%p277_p6)
}
  0x53   :  { %s281_s22 = scalar_lea.hbm %s455_s3, 32 }
  0x54   :  { %p282_p7 = scmp.ne.s32.totalorder %s455_s3, %s281_s22  ;;  %p285_p8 = scmp.lt.u32.totalorder %s281_s22, %s455_s3 }
  0x56   :  { %p287_p9 = pnand %p285_p8, %p282_p7 }
  0x58   :  { %290 = shalt.err (!%p287_p9)
}
  0x59   :  { %184 = dma.vmem_to_hbm [thread:$0]  %s182_s14, 32, %s455_s3, [#allocation12]   ;;  %126 = vst [vmem:[#allocation10] sm:$0x3] %v124_v52 }
  0x5a   :  { %s291_s29 = scalar_lea.vmem %s401_s16, 32  ;;  %p296_p11 = scmp.lt.s32.totalorder %s401_s16, %s401_s16 }
  0x5b   :  { %p292_p10 = scmp.ne.s32.totalorder %s401_s16, %s291_s29  ;;  %p297_p12 = scmp.lt.s32.totalorder %s291_s29, %s291_s29 }
  0x5d   :  { %p298_p13 = por %p297_p12, %p296_p11 }
  0x5f   :  { %p299_p0 = pnand %p298_p13, %p292_p10 }
  0x61   :  { %302 = shalt.err (!%p299_p0)
}
  0x62   :  { %s303_s6 = scalar_lea.hbm %s456_s4, 32 }
  0x63   :  { %p304_p1 = scmp.ne.s32.totalorder %s456_s4, %s303_s6  ;;  %p307_p2 = scmp.lt.u32.totalorder %s303_s6, %s456_s4 }
  0x65   :  { %p309_p3 = pnand %p307_p2, %p304_p1 }
  0x67   :  { %312 = shalt.err (!%p309_p3)
}
  0x68   :  { %194 = dma.vmem_to_hbm [thread:$0]  %s401_s16, 32, %s456_s4, [#allocation12]  }
  0x69   :  { %s313_s12 = scalar_lea.vmem %s403_s18, 32  ;;  %p318_p5 = scmp.lt.s32.totalorder %s403_s18, %s403_s18 }
  0x6a   :  { %p314_p4 = scmp.ne.s32.totalorder %s403_s18, %s313_s12  ;;  %p319_p6 = scmp.lt.s32.totalorder %s313_s12, %s313_s12 }
  0x6c   :  { %p320_p7 = por %p319_p6, %p318_p5 }
  0x6e   :  { %p321_p8 = pnand %p320_p7, %p314_p4 }
  0x70   :  { %324 = shalt.err (!%p321_p8)
}
  0x71   :  { %s325_s1 = scalar_lea.hbm %s454_s2, 32 }
  0x72   :  { %p326_p9 = scmp.ne.s32.totalorder %s454_s2, %s325_s1  ;;  %p329_p10 = scmp.lt.u32.totalorder %s325_s1, %s454_s2 }
  0x74   :  { %p331_p11 = pnand %p329_p10, %p326_p9 }
  0x76   :  { %334 = shalt.err (!%p331_p11)
}
  0x77   :  { %174 = dma.vmem_to_hbm [thread:$0]  %s403_s18, 32, %s454_s2, [#allocation7]  }
  0x78   :  { %339 = dma.done.wait [#allocation7], 32  }
  0x79   :  { %340 = vsyncadd [#allocation7], 4294967264 }
  0x7a   :  { %341 = dma.done.wait [#allocation12], 64  }
  0x7b   :  { %342 = vsyncadd [#allocation12], 4294967232 }
  0x7c   :  { %204 = vsyncpa [#allocation6], 1 }
  0x7d   :  { %205 = vsyncpa [#allocation9], 1 }
  0x7e   :  { %206 = vsyncpa [#allocation7], 1 }
  0x7f   :  { %207 = vsyncpa [#allocation12], 1 }

</bundles_post_ra>
